<compile_context>
chip_gen: v5e
topology: v5e:2x2
jax: 0.10.0
libtpu: 0.0.40
codegen_flags: <defaults>
</compile_context>

<pallas_src>
import functools

import jax
import jax.numpy as jnp
from jax import lax
from jax.experimental import pallas as pl
from jax.experimental.pallas import tpu as pltpu


# --------------------------------------------------------------------------
# Pass 1: 1x1 query / key / (value @ mix) convs, channels-on-sublanes, bf16.
# --------------------------------------------------------------------------
def _qkv_proj_kernel(x_ref, wq_ref, bq_ref, wk_ref, bk_ref, wvm_ref,
                     q_ref, k_ref, v_ref):
    xb = x_ref[0]                                              # (C, TP) f32
    cn = (((0,), (0,)), ((), ()))                              # contract channel dim
    q = lax.dot_general(wq_ref[...], xb, dimension_numbers=cn,
                        preferred_element_type=jnp.float32) + bq_ref[...]
    k = lax.dot_general(wk_ref[...], xb, dimension_numbers=cn,
                        preferred_element_type=jnp.float32) + bk_ref[...]
    v = lax.dot_general(wvm_ref[...], xb, dimension_numbers=cn,
                        preferred_element_type=jnp.float32)    # value bias folded out
    q_ref[0] = q.astype(jnp.bfloat16)
    k_ref[0] = k.astype(jnp.bfloat16)
    # Append a row of ones: the MXU matmul that accumulates attn@V then also
    # accumulates the softmax denominator with f32 accumulation.
    ones = jnp.ones((1, v.shape[1]), jnp.float32)
    v_ref[0] = jnp.concatenate([v, ones], axis=0).astype(jnp.bfloat16)


# --------------------------------------------------------------------------
# Pass 2: flash attention (online softmax over kv tiles), transposed layout.
# --------------------------------------------------------------------------
def _flash_attn_kernel(q_ref, k_ref, v_ref, bo_ref, y_ref, mom_ref,
                       m_sc, acc_sc, *, exp_dtype):
    ki = pl.program_id(2)
    nk = pl.num_programs(2)
    c_out = y_ref.shape[1]

    @pl.when(ki == 0)
    def _init():
        m_sc[...] = jnp.full(m_sc.shape, -jnp.inf, jnp.float32)
        acc_sc[...] = jnp.zeros(acc_sc.shape, jnp.float32)

    q = q_ref[0]                                               # (Cq, TQ)   bf16
    k = k_ref[0]                                               # (Cq, TKV)  bf16
    vx = v_ref[0]                                              # (C+1, TKV) bf16

    # s[j, i] = <k_j, q_i>  -> (TKV, TQ), bf16 MXU inputs, f32 accumulation.
    s = lax.dot_general(k, q, dimension_numbers=(((0,), (0,)), ((), ())),
                        preferred_element_type=jnp.float32)

    # online softmax update; max/exp operate on lane-dense (·, TQ) tiles.
    m_prev = m_sc[...]                                         # (1, TQ)
    m_new = jnp.maximum(m_prev, jnp.max(s, axis=0, keepdims=True))
    alpha = jnp.exp((m_prev - m_new).astype(exp_dtype)).astype(jnp.float32)
    p = jnp.exp((s - m_new).astype(exp_dtype)).astype(jnp.bfloat16)  # (TKV, TQ)
    # rows 0..C-1: attn @ V accumulator; row C: softmax denominator l.
    acc_sc[...] = alpha * acc_sc[...] + lax.dot_general(
        vx, p, dimension_numbers=(((1,), (0,)), ((), ())),
        preferred_element_type=jnp.float32)                    # (C+1, TQ)
    m_sc[...] = m_new

    @pl.when(ki == nk - 1)
    def _finalize():
        acc = acc_sc[...]
        inv_l = pl.reciprocal(acc[c_out:, :], approx=True)     # (1, TQ) on EUP
        y = acc[:c_out, :] * inv_l + bo_ref[...]               # (C, TQ) f32
        # Partial BatchNorm moments for this (batch, q tile).
        # NOTE: batch variance is later formed as E[y^2]-E[y]^2 in f32; fine
        # while |mean| ~ std (the case here); use shifted sums if that changes.
        s1 = jnp.sum(y, axis=1, keepdims=True)                 # (C, 1)
        s2 = jnp.sum(y * y, axis=1, keepdims=True)             # (C, 1)
        mom_ref[0, 0] = jnp.concatenate([s1, s2], axis=1)      # (C, 2)
        y_ref[0] = y.astype(y_ref.dtype)                       # lane-dense bf16 store


# --------------------------------------------------------------------------
# Pass 3: BatchNorm (folded to per-channel FMA) + residual.
# --------------------------------------------------------------------------
def _bn_residual_kernel(y_ref, x_ref, scale_ref, shift_ref, o_ref):
    o_ref[...] = (y_ref[...].astype(jnp.float32) * scale_ref[...]
                  + shift_ref[...] + x_ref[...])


def _pick_tile(n, cap):
    """Largest multiple of 128 <= cap that divides n, else n itself (full axis)."""
    if n <= cap:
        return n
    t = (cap // 128) * 128
    while t >= 128:
        if n % t == 0:
            return t
        t -= 128
    return n


def _tpu_tuning():
    """Per-generation (TQ cap, TKV cap, scoped-VMEM limit, exp dtype, gen tag)."""
    try:
        kind = jax.devices()[0].device_kind.lower()
    except Exception:
        kind = ""
    if "v5" in kind:   # 128 MiB VMEM, no bf16 EUP -> f32 exp
        return 512, 2048, 64 * 1024 * 1024, jnp.float32, "v5"
    if "v6" in kind:   # 128 MiB VMEM, bf16 EUP
        return 512, 2048, 64 * 1024 * 1024, jnp.bfloat16, "v6"
    if "v7" in kind:   # 64 MiB VMEM (cap scoped at 48 MiB), bf16 EUP, 2 TCs
        return 256, 1024, 48 * 1024 * 1024, jnp.bfloat16, "v7"
    return 256, 1024, 32 * 1024 * 1024, jnp.float32, "other"


def self_attn_forward(x_nchw, params, eps=1e-5):
    B, C, W, H = x_nchw.shape
    N = W * H
    Cq = params["wq"].shape[1]

    tq_cap, tkv_cap, vmem_limit, exp_dtype, gen = _tpu_tuning()

    # NCHW -> (B, C, N): free reshape; channels on sublanes, N on lanes.
    x = x_nchw.reshape(B, C, N).astype(jnp.float32)

    # mix_conv folded into the value conv: softmax rows sum to 1, so
    #   ((attn @ (x wv + bv)) wm + bm) == attn @ (x (wv wm)) + (bv wm + bm).
    wvm = params["wv"] @ params["wm"]                                # (C, C)
    bias_out = (params["bv"] @ params["wm"] + params["bm"]).reshape(C, 1)
    bq = params["bq"].reshape(Cq, 1)
    bk = params["bk"].reshape(Cq, 1)

    # ---- pass 1: projections once per element (bf16 outputs) --------------
    TP = _pick_tile(N, 2048)

    def _full2(shape):
        return pl.BlockSpec(shape, lambda b, j, _z=(0,) * len(shape): _z)

    q_proj, k_proj, v_proj = pl.pallas_call(
        _qkv_proj_kernel,
        out_shape=(
            jax.ShapeDtypeStruct((B, Cq, N), jnp.bfloat16),
            jax.ShapeDtypeStruct((B, Cq, N), jnp.bfloat16),
            jax.ShapeDtypeStruct((B, C + 1, N), jnp.bfloat16),   # [V ; ones]
        ),
        grid=(B, N // TP),
        in_specs=[
            pl.BlockSpec((1, C, TP), lambda b, j: (b, 0, j)),
            _full2((C, Cq)), _full2((Cq, 1)),
            _full2((C, Cq)), _full2((Cq, 1)),
            _full2((C, C)),
        ],
        out_specs=(
            pl.BlockSpec((1, Cq, TP), lambda b, j: (b, 0, j)),
            pl.BlockSpec((1, Cq, TP), lambda b, j: (b, 0, j)),
            pl.BlockSpec((1, C + 1, TP), lambda b, j: (b, 0, j)),
        ),
        compiler_params=pltpu.CompilerParams(
            dimension_semantics=("parallel", "parallel"),
            vmem_limit_bytes=vmem_limit),
    )(x, params["wq"], bq, params["wk"], bk, wvm)

    # ---- pass 2: flash attention over kv tiles -----------------------------
    TQ = _pick_tile(N, tq_cap)
    TKV = _pick_tile(N, tkv_cap)
    nq = N // TQ
    # v7x has 2 TensorCores: keep the parallel extent B*nq even when possible.
    if gen == "v7" and (B * nq) % 2 == 1 and TQ >= 256:
        tq2 = _pick_tile(N, TQ // 2)
        if tq2 < TQ and (B * (N // tq2)) % 2 == 0:
            TQ, nq = tq2, N // tq2
    nkv = N // TKV

    cost = pl.CostEstimate(
        flops=int(2 * B * N * N * (Cq + C + 1)),
        transcendentals=int(B * N * N),
        bytes_accessed=int(2 * B * N * (Cq + nq * (2 * Cq + C + 1) + C)
                           + 4 * B * nq * 2 * C))

    def _full3(shape):
        return pl.BlockSpec(shape, lambda b, qi, ki, _z=(0,) * len(shape): _z)

    y, moments = pl.pallas_call(
        functools.partial(_flash_attn_kernel, exp_dtype=exp_dtype),
        out_shape=(
            jax.ShapeDtypeStruct((B, C, N), jnp.bfloat16),       # y (pre-BN)
            jax.ShapeDtypeStruct((B, nq, C, 2), jnp.float32),    # BN moments
        ),
        grid=(B, nq, nkv),
        in_specs=[
            pl.BlockSpec((1, Cq, TQ), lambda b, qi, ki: (b, 0, qi)),     # Q
            pl.BlockSpec((1, Cq, TKV), lambda b, qi, ki: (b, 0, ki)),    # K
            pl.BlockSpec((1, C + 1, TKV), lambda b, qi, ki: (b, 0, ki)), # [V;1]
            _full3((C, 1)),                                              # folded bias
        ],
        out_specs=(
            pl.BlockSpec((1, C, TQ), lambda b, qi, ki: (b, 0, qi)),
            pl.BlockSpec((1, 1, C, 2), lambda b, qi, ki: (b, qi, 0, 0)),
        ),
        scratch_shapes=[
            pltpu.VMEM((1, TQ), jnp.float32),       # running max m
            pltpu.VMEM((C + 1, TQ), jnp.float32),   # [attn@V ; l] accumulator
        ],
        compiler_params=pltpu.CompilerParams(
            dimension_semantics=("parallel", "parallel", "arbitrary"),
            vmem_limit_bytes=vmem_limit),
        cost_estimate=cost,
    )(q_proj, k_proj, v_proj, bias_out)

    # BatchNorm2d training-mode (biased) batch statistics from the kernel
    # moments: no extra HBM pass over y.
    cnt = float(B * N)
    s1 = jnp.sum(moments[..., 0], axis=(0, 1))
    s2 = jnp.sum(moments[..., 1], axis=(0, 1))
    mean = s1 / cnt
    var = jnp.maximum(s2 / cnt - mean * mean, 0.0)
    scale = params["gamma"] * lax.rsqrt(var + eps)               # gamma / std
    shift = params["beta"] - mean * scale

    # ---- pass 3: BN + residual (mem-bound; large lane-dense tiles) ---------
    TN = _pick_tile(N, 8192)
    out = pl.pallas_call(
        _bn_residual_kernel,
        out_shape=jax.ShapeDtypeStruct((B, C, N), jnp.float32),
        grid=(B, N // TN),
        in_specs=[
            pl.BlockSpec((1, C, TN), lambda b, j: (b, 0, j)),    # y (bf16)
            pl.BlockSpec((1, C, TN), lambda b, j: (b, 0, j)),    # x residual
            pl.BlockSpec((1, C, 1), lambda b, j: (0, 0, 0)),     # scale
            pl.BlockSpec((1, C, 1), lambda b, j: (0, 0, 0)),     # shift
        ],
        out_specs=pl.BlockSpec((1, C, TN), lambda b, j: (b, 0, j)),
        compiler_params=pltpu.CompilerParams(
            dimension_semantics=("parallel", "parallel"),
            vmem_limit_bytes=vmem_limit),
    )(y, x, scale.reshape(1, C, 1), shift.reshape(1, C, 1))

    # (B, C, N) is already NCHW-flattened: free reshape back.
    return out.reshape(B, C, W, H)


def ref_forward(x_nchw, params, eps=1e-5):
    """Pure-JAX f32 reference with the PyTorch module's semantics."""
    B, C, W, H = x_nchw.shape
    N = W * H
    x = jnp.transpose(x_nchw.reshape(B, C, N), (0, 2, 1)).astype(jnp.float32)
    q = x @ params["wq"] + params["bq"]
    k = x @ params["wk"] + params["bk"]
    v = x @ params["wv"] + params["bv"]
    energy = jnp.einsum("bic,bjc->bij", q, k)
    attn = jax.nn.softmax(energy, axis=-1)
    out = jnp.einsum("bij,bjc->bic", attn, v)
    y = out @ params["wm"] + params["bm"]
    mean = jnp.mean(y, axis=(0, 1))
    var = jnp.mean((y - mean) ** 2, axis=(0, 1))
    bn = (y - mean) / jnp.sqrt(var + eps) * params["gamma"] + params["beta"]
    o = bn + x
    return jnp.transpose(o, (0, 2, 1)).reshape(B, C, W, H)


if __name__ == "__main__":
    key = jax.random.PRNGKey(0)
    B, C, W, H = 2, 16, 8, 8          # in_dim=16 -> query/key channels = 2
    Cq = C // 8
    ks = jax.random.split(key, 9)

    x = jax.random.normal(ks[0], (B, C, W, H), dtype=jnp.float32)

    # 1x1-conv weights of shape (Cout, Cin, 1, 1) stored transposed as (Cin, Cout).
    params = {
        "wq": 0.2 * jax.random.normal(ks[1], (C, Cq), jnp.float32),
        "bq": 0.1 * jax.random.normal(ks[2], (1, Cq), jnp.float32),
        "wk": 0.2 * jax.random.normal(ks[3], (C, Cq), jnp.float32),
        "bk": 0.1 * jax.random.normal(ks[4], (1, Cq), jnp.float32),
        "wv": 0.2 * jax.random.normal(ks[5], (C, C), jnp.float32),
        "bv": 0.1 * jax.random.normal(ks[6], (1, C), jnp.float32),
        "wm": 0.2 * jax.random.normal(ks[7], (C, C), jnp.float32),
        "bm": 0.1 * jax.random.normal(ks[8], (1, C), jnp.float32),
        # The module initializes BN weight/bias to 0 (BN branch contributes 0);
        # use nonzero gamma/beta here so the BN path is actually validated.
        "gamma": jnp.linspace(0.1, 0.5, C, dtype=jnp.float32),
        "beta": jnp.linspace(-0.2, 0.2, C, dtype=jnp.float32),
    }

    fwd = jax.jit(self_attn_forward)

    out = jax.block_until_ready(fwd(x, params))
    ref = jax.block_until_ready(ref_forward(x, params))

    assert out.shape == x.shape, (out.shape, x.shape)
    # bf16 MXU inputs, bf16 exp on v6e/v7x, bf16 y store and approximate
    # reciprocal -> looser tolerance than pure f32.
    max_err = float(jnp.max(jnp.abs(out - ref)))
    assert jnp.allclose(out, ref, atol=5e-2, rtol=5e-2), (
        f"mismatch vs reference, max abs err = {max_err}")

    # gamma = beta = 0 (the module's default init): BN branch is exactly zero,
    # so the forward must reduce to the identity residual out == x.
    params0 = dict(params,
                   gamma=jnp.zeros((C,), jnp.float32),
                   beta=jnp.zeros((C,), jnp.float32))
    out0 = jax.block_until_ready(fwd(x, params0))
    assert jnp.allclose(out0, x, atol=1e-6), "gamma=beta=0 should give out == x"

    print("KERNEL_OK")
</pallas_src>

<mosaic_0001>
module attributes {stable_mosaic.version = 11 : i64} {
  func.func @_flash_attn_kernel(%arg0: i32, %arg1: i32, %arg2: i32, %arg3: memref<1x2x64xbf16, #tpu.memory_space<vmem>>, %arg4: memref<1x2x64xbf16, #tpu.memory_space<vmem>>, %arg5: memref<1x17x64xbf16, #tpu.memory_space<vmem>>, %arg6: memref<16x1xf32, #tpu.memory_space<vmem>>, %arg7: memref<1x16x64xbf16, #tpu.memory_space<vmem>>, %arg8: memref<1x1x16x2xf32, #tpu.memory_space<vmem>>, %arg9: memref<1x64xf32, #tpu.memory_space<vmem>>, %arg10: memref<17x64xf32, #tpu.memory_space<vmem>>) attributes {dimension_semantics = [#tpu.dimension_semantics<parallel>, #tpu.dimension_semantics<parallel>, #tpu.dimension_semantics<arbitrary>], iteration_bounds = array<i64: 2, 1, 1>, scalar_prefetch = 0 : i64, scratch_operands = 2 : i64, tpu.core_type = #tpu.core_type<tc>, window_params = [{transform_indices = @transform_0, window_bounds = array<i64: 1, 2, 64>}, {transform_indices = @transform_1, window_bounds = array<i64: 1, 2, 64>}, {transform_indices = @transform_2, window_bounds = array<i64: 1, 17, 64>}, {pipeline_mode = #tpu.pipeline_mode<synchronous>, transform_indices = @transform_3, window_bounds = array<i64: 16, 1>}, {transform_indices = @transform_4, window_bounds = array<i64: 1, 16, 64>}, {transform_indices = @transform_5, window_bounds = array<i64: 1, 1, 16, 2>}]} {
    %c0_i32 = arith.constant 0 : i32
    %0 = arith.cmpi eq, %arg2, %c0_i32 : i32
    %1 = arith.extui %0 : i1 to i32
    %c0_i32_0 = arith.constant 0 : i32
    %2 = arith.cmpi ne, %1, %c0_i32_0 : i32
    scf.if %2 {
      %cst_21 = arith.constant 0xFF800000 : f32
      %30 = vector.broadcast %cst_21 : f32 to vector<1x64xf32>
      %c0_22 = arith.constant 0 : index
      %c0_23 = arith.constant 0 : index
      %31 = vector.load %arg9[%c0_22, %c0_23] : memref<1x64xf32, #tpu.memory_space<vmem>>, vector<1x64xf32>
      tpu.vector_store %arg9[%c0_22, %c0_23], %30 {strides = array<i32>} : memref<1x64xf32, #tpu.memory_space<vmem>>, vector<1x64xf32>,
      %cst_24 = arith.constant 0.000000e+00 : f32
      %32 = vector.broadcast %cst_24 : f32 to vector<17x64xf32>
      %c0_25 = arith.constant 0 : index
      %c0_26 = arith.constant 0 : index
      %33 = vector.load %arg10[%c0_25, %c0_26] : memref<17x64xf32, #tpu.memory_space<vmem>>, vector<17x64xf32>
      tpu.vector_store %arg10[%c0_25, %c0_26], %32 {strides = array<i32>} : memref<17x64xf32, #tpu.memory_space<vmem>>, vector<17x64xf32>,
    } else {
    }
    %c0 = arith.constant 0 : index
    %c0_1 = arith.constant 0 : index
    %c0_2 = arith.constant 0 : index
    %3 = vector.load %arg3[%c0, %c0_1, %c0_2] : memref<1x2x64xbf16, #tpu.memory_space<vmem>>, vector<1x2x64xbf16>
    %4 = vector.shape_cast %3 : vector<1x2x64xbf16> to vector<2x64xbf16>
    %c0_3 = arith.constant 0 : index
    %c0_4 = arith.constant 0 : index
    %c0_5 = arith.constant 0 : index
    %5 = vector.load %arg4[%c0_3, %c0_4, %c0_5] : memref<1x2x64xbf16, #tpu.memory_space<vmem>>, vector<1x2x64xbf16>
    %6 = vector.shape_cast %5 : vector<1x2x64xbf16> to vector<2x64xbf16>
    %c0_6 = arith.constant 0 : index
    %c0_7 = arith.constant 0 : index
    %c0_8 = arith.constant 0 : index
    %7 = vector.load %arg5[%c0_6, %c0_7, %c0_8] : memref<1x17x64xbf16, #tpu.memory_space<vmem>>, vector<1x17x64xbf16>
    %8 = vector.shape_cast %7 : vector<1x17x64xbf16> to vector<17x64xbf16>
    %cst = arith.constant dense<0.000000e+00> : vector<64x64xf32>
    %9 = tpu.matmul %6, %4, %cst {dimension_numbers = #tpu.dot_dimension_numbers<[0], [0], [1], [1], [0, 1, 1, 1], [], []>} : vector<2x64xbf16>, vector<2x64xbf16>, vector<64x64xf32> -> vector<64x64xf32>
    %c0_9 = arith.constant 0 : index
    %c0_10 = arith.constant 0 : index
    %10 = vector.load %arg9[%c0_9, %c0_10] : memref<1x64xf32, #tpu.memory_space<vmem>>, vector<1x64xf32>
    %cst_11 = arith.constant dense<0xFF800000> : vector<64xf32>
    %11 = vector.multi_reduction <maximumf>, %9, %cst_11 [0] : vector<64x64xf32> to vector<64xf32>
    %12 = vector.shape_cast %11 : vector<64xf32> to vector<1x64xf32>
    %13 = arith.maximumf %10, %12 : vector<1x64xf32>
    %14 = arith.subf %10, %13 : vector<1x64xf32>
    %15 = math.exp %14 : vector<1x64xf32>
    %16 = vector.broadcast %13 : vector<1x64xf32> to vector<64x64xf32>
    %17 = arith.subf %9, %16 : vector<64x64xf32>
    %18 = math.exp %17 : vector<64x64xf32>
    %19 = arith.truncf %18 : vector<64x64xf32> to vector<64x64xbf16>
    %c0_12 = arith.constant 0 : index
    %c0_13 = arith.constant 0 : index
    %20 = vector.load %arg10[%c0_12, %c0_13] : memref<17x64xf32, #tpu.memory_space<vmem>>, vector<17x64xf32>
    %21 = vector.broadcast %15 : vector<1x64xf32> to vector<17x64xf32>
    %22 = arith.mulf %21, %20 : vector<17x64xf32>
    %cst_14 = arith.constant dense<0.000000e+00> : vector<17x64xf32>
    %23 = tpu.matmul %8, %19, %cst_14 {dimension_numbers = #tpu.dot_dimension_numbers<[1], [0], [0], [1], [0, 0, 1, 1], [], []>} : vector<17x64xbf16>, vector<64x64xbf16>, vector<17x64xf32> -> vector<17x64xf32>
    %24 = arith.addf %22, %23 : vector<17x64xf32>
    %c0_15 = arith.constant 0 : index
    %c0_16 = arith.constant 0 : index
    %25 = vector.load %arg10[%c0_15, %c0_16] : memref<17x64xf32, #tpu.memory_space<vmem>>, vector<17x64xf32>
    tpu.vector_store %arg10[%c0_15, %c0_16], %24 {strides = array<i32>} : memref<17x64xf32, #tpu.memory_space<vmem>>, vector<17x64xf32>,
    %c0_17 = arith.constant 0 : index
    %c0_18 = arith.constant 0 : index
    %26 = vector.load %arg9[%c0_17, %c0_18] : memref<1x64xf32, #tpu.memory_space<vmem>>, vector<1x64xf32>
    tpu.vector_store %arg9[%c0_17, %c0_18], %13 {strides = array<i32>} : memref<1x64xf32, #tpu.memory_space<vmem>>, vector<1x64xf32>,
    %c0_i32_19 = arith.constant 0 : i32
    %27 = arith.cmpi eq, %arg2, %c0_i32_19 : i32
    %28 = arith.extui %27 : i1 to i32
    %c0_i32_20 = arith.constant 0 : i32
    %29 = arith.cmpi ne, %28, %c0_i32_20 : i32
    scf.if %29 {
      %c0_21 = arith.constant 0 : index
      %c0_22 = arith.constant 0 : index
      %30 = vector.load %arg10[%c0_21, %c0_22] : memref<17x64xf32, #tpu.memory_space<vmem>>, vector<17x64xf32>
      %31 = vector.extract_strided_slice %30 {offsets = [16, 0], sizes = [1, 64], strides = [1, 1]} : vector<17x64xf32> to vector<1x64xf32>
      %32 = tpu.reciprocal %31 {approx = true} : vector<1x64xf32> -> vector<1x64xf32>
      %33 = vector.extract_strided_slice %30 {offsets = [0, 0], sizes = [16, 64], strides = [1, 1]} : vector<17x64xf32> to vector<16x64xf32>
      %34 = vector.broadcast %32 : vector<1x64xf32> to vector<16x64xf32>
      %35 = arith.mulf %33, %34 : vector<16x64xf32>
      %c0_23 = arith.constant 0 : index
      %c0_24 = arith.constant 0 : index
      %36 = vector.load %arg6[%c0_23, %c0_24] : memref<16x1xf32, #tpu.memory_space<vmem>>, vector<16x1xf32>
      %37 = vector.broadcast %36 : vector<16x1xf32> to vector<16x64xf32>
      %38 = arith.addf %35, %37 : vector<16x64xf32>
      %cst_25 = arith.constant dense<0.000000e+00> : vector<16xf32>
      %39 = vector.multi_reduction <add>, %38, %cst_25 [1] : vector<16x64xf32> to vector<16xf32>
      %40 = vector.shape_cast %39 : vector<16xf32> to vector<16x1xf32>
      %41 = arith.mulf %38, %38 : vector<16x64xf32>
      %cst_26 = arith.constant dense<0.000000e+00> : vector<16xf32>
      %42 = vector.multi_reduction <add>, %41, %cst_26 [1] : vector<16x64xf32> to vector<16xf32>
      %43 = vector.shape_cast %42 : vector<16xf32> to vector<16x1xf32>
      %44 = tpu.concatenate %40, %43 in 1 : vector<16x1xf32>, vector<16x1xf32> -> vector<16x2xf32>
      %c0_27 = arith.constant 0 : index
      %c0_28 = arith.constant 0 : index
      %c0_29 = arith.constant 0 : index
      %c0_30 = arith.constant 0 : index
      %45 = vector.load %arg8[%c0_27, %c0_28, %c0_29, %c0_30] : memref<1x1x16x2xf32, #tpu.memory_space<vmem>>, vector<1x1x16x2xf32>
      %46 = vector.shape_cast %45 : vector<1x1x16x2xf32> to vector<16x2xf32>
      %47 = vector.shape_cast %44 : vector<16x2xf32> to vector<1x1x16x2xf32>
      tpu.vector_store %arg8[%c0_27, %c0_28, %c0_29, %c0_30], %47 {strides = array<i32>} : memref<1x1x16x2xf32, #tpu.memory_space<vmem>>, vector<1x1x16x2xf32>,
      %48 = arith.truncf %38 : vector<16x64xf32> to vector<16x64xbf16>
      %c0_31 = arith.constant 0 : index
      %c0_32 = arith.constant 0 : index
      %c0_33 = arith.constant 0 : index
      %49 = vector.load %arg7[%c0_31, %c0_32, %c0_33] : memref<1x16x64xbf16, #tpu.memory_space<vmem>>, vector<1x16x64xbf16>
      %50 = vector.shape_cast %49 : vector<1x16x64xbf16> to vector<16x64xbf16>
      %51 = vector.shape_cast %48 : vector<16x64xbf16> to vector<1x16x64xbf16>
      tpu.vector_store %arg7[%c0_31, %c0_32, %c0_33], %51 {strides = array<i32>} : memref<1x16x64xbf16, #tpu.memory_space<vmem>>, vector<1x16x64xbf16>,
    } else {
    }
    return
  }
  func.func @transform_0(%arg0: i32, %arg1: i32, %arg2: i32) -> (i32, i32, i32) {
    %c0_i32 = arith.constant 0 : i32
    %c0_i32_0 = arith.constant 0 : i32
    return %arg0, %c0_i32, %arg1 : i32, i32, i32
  }
  func.func @transform_1(%arg0: i32, %arg1: i32, %arg2: i32) -> (i32, i32, i32) {
    %c0_i32 = arith.constant 0 : i32
    %c0_i32_0 = arith.constant 0 : i32
    return %arg0, %c0_i32, %arg2 : i32, i32, i32
  }
  func.func @transform_2(%arg0: i32, %arg1: i32, %arg2: i32) -> (i32, i32, i32) {
    %c0_i32 = arith.constant 0 : i32
    %c0_i32_0 = arith.constant 0 : i32
    return %arg0, %c0_i32, %arg2 : i32, i32, i32
  }
  func.func @transform_3(%arg0: i32, %arg1: i32, %arg2: i32) -> (i32, i32) {
    %c0_i32 = arith.constant 0 : i32
    %c0_i32_0 = arith.constant 0 : i32
    %c0_i32_1 = arith.constant 0 : i32
    return %c0_i32, %c0_i32_0 : i32, i32
  }
  func.func @transform_4(%arg0: i32, %arg1: i32, %arg2: i32) -> (i32, i32, i32) {
    %c0_i32 = arith.constant 0 : i32
    %c0_i32_0 = arith.constant 0 : i32
    return %arg0, %c0_i32, %arg1 : i32, i32, i32
  }
  func.func @transform_5(%arg0: i32, %arg1: i32, %arg2: i32) -> (i32, i32, i32, i32) {
    %c0_i32 = arith.constant 0 : i32
    %c0_i32_0 = arith.constant 0 : i32
    %c0_i32_1 = arith.constant 0 : i32
    return %arg0, %arg1, %c0_i32, %c0_i32_0 : i32, i32, i32, i32
  }
}

module attributes {stable_mosaic.version = 11 : i64} {
  func.func @_qkv_proj_kernel(%arg0: i32, %arg1: i32, %arg2: memref<1x16x64xf32, #tpu.memory_space<vmem>>, %arg3: memref<16x2xf32, #tpu.memory_space<vmem>>, %arg4: memref<2x1xf32, #tpu.memory_space<vmem>>, %arg5: memref<16x2xf32, #tpu.memory_space<vmem>>, %arg6: memref<2x1xf32, #tpu.memory_space<vmem>>, %arg7: memref<16x16xf32, #tpu.memory_space<vmem>>, %arg8: memref<1x2x64xbf16, #tpu.memory_space<vmem>>, %arg9: memref<1x2x64xbf16, #tpu.memory_space<vmem>>, %arg10: memref<1x17x64xbf16, #tpu.memory_space<vmem>>) attributes {dimension_semantics = [#tpu.dimension_semantics<parallel>, #tpu.dimension_semantics<parallel>], iteration_bounds = array<i64: 2, 1>, scalar_prefetch = 0 : i64, scratch_operands = 0 : i64, tpu.core_type = #tpu.core_type<tc>, window_params = [{transform_indices = @transform_0, window_bounds = array<i64: 1, 16, 64>}, {pipeline_mode = #tpu.pipeline_mode<synchronous>, transform_indices = @transform_1, window_bounds = array<i64: 16, 2>}, {pipeline_mode = #tpu.pipeline_mode<synchronous>, transform_indices = @transform_2, window_bounds = array<i64: 2, 1>}, {pipeline_mode = #tpu.pipeline_mode<synchronous>, transform_indices = @transform_3, window_bounds = array<i64: 16, 2>}, {pipeline_mode = #tpu.pipeline_mode<synchronous>, transform_indices = @transform_4, window_bounds = array<i64: 2, 1>}, {pipeline_mode = #tpu.pipeline_mode<synchronous>, transform_indices = @transform_5, window_bounds = array<i64: 16, 16>}, {transform_indices = @transform_6, window_bounds = array<i64: 1, 2, 64>}, {transform_indices = @transform_7, window_bounds = array<i64: 1, 2, 64>}, {transform_indices = @transform_8, window_bounds = array<i64: 1, 17, 64>}]} {
    %c0 = arith.constant 0 : index
    %c0_0 = arith.constant 0 : index
    %c0_1 = arith.constant 0 : index
    %0 = vector.load %arg2[%c0, %c0_0, %c0_1] : memref<1x16x64xf32, #tpu.memory_space<vmem>>, vector<1x16x64xf32>
    %1 = vector.shape_cast %0 : vector<1x16x64xf32> to vector<16x64xf32>
    %c0_2 = arith.constant 0 : index
    %c0_3 = arith.constant 0 : index
    %2 = vector.load %arg3[%c0_2, %c0_3] : memref<16x2xf32, #tpu.memory_space<vmem>>, vector<16x2xf32>
    %cst = arith.constant dense<0.000000e+00> : vector<2x64xf32>
    %3 = tpu.matmul %2, %1, %cst {dimension_numbers = #tpu.dot_dimension_numbers<[0], [0], [1], [1], [0, 1, 1, 1], [], []>} : vector<16x2xf32>, vector<16x64xf32>, vector<2x64xf32> -> vector<2x64xf32>
    %c0_4 = arith.constant 0 : index
    %c0_5 = arith.constant 0 : index
    %4 = vector.load %arg4[%c0_4, %c0_5] : memref<2x1xf32, #tpu.memory_space<vmem>>, vector<2x1xf32>
    %5 = vector.broadcast %4 : vector<2x1xf32> to vector<2x64xf32>
    %6 = arith.addf %3, %5 : vector<2x64xf32>
    %c0_6 = arith.constant 0 : index
    %c0_7 = arith.constant 0 : index
    %7 = vector.load %arg5[%c0_6, %c0_7] : memref<16x2xf32, #tpu.memory_space<vmem>>, vector<16x2xf32>
    %cst_8 = arith.constant dense<0.000000e+00> : vector<2x64xf32>
    %8 = tpu.matmul %7, %1, %cst_8 {dimension_numbers = #tpu.dot_dimension_numbers<[0], [0], [1], [1], [0, 1, 1, 1], [], []>} : vector<16x2xf32>, vector<16x64xf32>, vector<2x64xf32> -> vector<2x64xf32>
    %c0_9 = arith.constant 0 : index
    %c0_10 = arith.constant 0 : index
    %9 = vector.load %arg6[%c0_9, %c0_10] : memref<2x1xf32, #tpu.memory_space<vmem>>, vector<2x1xf32>
    %10 = vector.broadcast %9 : vector<2x1xf32> to vector<2x64xf32>
    %11 = arith.addf %8, %10 : vector<2x64xf32>
    %c0_11 = arith.constant 0 : index
    %c0_12 = arith.constant 0 : index
    %12 = vector.load %arg7[%c0_11, %c0_12] : memref<16x16xf32, #tpu.memory_space<vmem>>, vector<16x16xf32>
    %cst_13 = arith.constant dense<0.000000e+00> : vector<16x64xf32>
    %13 = tpu.matmul %12, %1, %cst_13 {dimension_numbers = #tpu.dot_dimension_numbers<[0], [0], [1], [1], [0, 1, 1, 1], [], []>} : vector<16x16xf32>, vector<16x64xf32>, vector<16x64xf32> -> vector<16x64xf32>
    %14 = arith.truncf %6 : vector<2x64xf32> to vector<2x64xbf16>
    %c0_14 = arith.constant 0 : index
    %c0_15 = arith.constant 0 : index
    %c0_16 = arith.constant 0 : index
    %15 = vector.load %arg8[%c0_14, %c0_15, %c0_16] : memref<1x2x64xbf16, #tpu.memory_space<vmem>>, vector<1x2x64xbf16>
    %16 = vector.shape_cast %15 : vector<1x2x64xbf16> to vector<2x64xbf16>
    %17 = vector.shape_cast %14 : vector<2x64xbf16> to vector<1x2x64xbf16>
    tpu.vector_store %arg8[%c0_14, %c0_15, %c0_16], %17 {strides = array<i32>} : memref<1x2x64xbf16, #tpu.memory_space<vmem>>, vector<1x2x64xbf16>,
    %18 = arith.truncf %11 : vector<2x64xf32> to vector<2x64xbf16>
    %c0_17 = arith.constant 0 : index
    %c0_18 = arith.constant 0 : index
    %c0_19 = arith.constant 0 : index
    %19 = vector.load %arg9[%c0_17, %c0_18, %c0_19] : memref<1x2x64xbf16, #tpu.memory_space<vmem>>, vector<1x2x64xbf16>
    %20 = vector.shape_cast %19 : vector<1x2x64xbf16> to vector<2x64xbf16>
    %21 = vector.shape_cast %18 : vector<2x64xbf16> to vector<1x2x64xbf16>
    tpu.vector_store %arg9[%c0_17, %c0_18, %c0_19], %21 {strides = array<i32>} : memref<1x2x64xbf16, #tpu.memory_space<vmem>>, vector<1x2x64xbf16>,
    %cst_20 = arith.constant 1.000000e+00 : f32
    %22 = vector.broadcast %cst_20 : f32 to vector<1x64xf32>
    %23 = tpu.concatenate %13, %22 in 0 : vector<16x64xf32>, vector<1x64xf32> -> vector<17x64xf32>
    %24 = arith.truncf %23 : vector<17x64xf32> to vector<17x64xbf16>
    %c0_21 = arith.constant 0 : index
    %c0_22 = arith.constant 0 : index
    %c0_23 = arith.constant 0 : index
    %25 = vector.load %arg10[%c0_21, %c0_22, %c0_23] : memref<1x17x64xbf16, #tpu.memory_space<vmem>>, vector<1x17x64xbf16>
    %26 = vector.shape_cast %25 : vector<1x17x64xbf16> to vector<17x64xbf16>
    %27 = vector.shape_cast %24 : vector<17x64xbf16> to vector<1x17x64xbf16>
    tpu.vector_store %arg10[%c0_21, %c0_22, %c0_23], %27 {strides = array<i32>} : memref<1x17x64xbf16, #tpu.memory_space<vmem>>, vector<1x17x64xbf16>,
    return
  }
  func.func @transform_0(%arg0: i32, %arg1: i32) -> (i32, i32, i32) {
    %c0_i32 = arith.constant 0 : i32
    %c0_i32_0 = arith.constant 0 : i32
    return %arg0, %c0_i32, %arg1 : i32, i32, i32
  }
  func.func @transform_1(%arg0: i32, %arg1: i32) -> (i32, i32) {
    %c0_i32 = arith.constant 0 : i32
    %c0_i32_0 = arith.constant 0 : i32
    %c0_i32_1 = arith.constant 0 : i32
    return %c0_i32, %c0_i32_0 : i32, i32
  }
  func.func @transform_2(%arg0: i32, %arg1: i32) -> (i32, i32) {
    %c0_i32 = arith.constant 0 : i32
    %c0_i32_0 = arith.constant 0 : i32
    %c0_i32_1 = arith.constant 0 : i32
    return %c0_i32, %c0_i32_0 : i32, i32
  }
  func.func @transform_3(%arg0: i32, %arg1: i32) -> (i32, i32) {
    %c0_i32 = arith.constant 0 : i32
    %c0_i32_0 = arith.constant 0 : i32
    %c0_i32_1 = arith.constant 0 : i32
    return %c0_i32, %c0_i32_0 : i32, i32
  }
  func.func @transform_4(%arg0: i32, %arg1: i32) -> (i32, i32) {
    %c0_i32 = arith.constant 0 : i32
    %c0_i32_0 = arith.constant 0 : i32
    %c0_i32_1 = arith.constant 0 : i32
    return %c0_i32, %c0_i32_0 : i32, i32
  }
  func.func @transform_5(%arg0: i32, %arg1: i32) -> (i32, i32) {
    %c0_i32 = arith.constant 0 : i32
    %c0_i32_0 = arith.constant 0 : i32
    %c0_i32_1 = arith.constant 0 : i32
    return %c0_i32, %c0_i32_0 : i32, i32
  }
  func.func @transform_6(%arg0: i32, %arg1: i32) -> (i32, i32, i32) {
    %c0_i32 = arith.constant 0 : i32
    %c0_i32_0 = arith.constant 0 : i32
    return %arg0, %c0_i32, %arg1 : i32, i32, i32
  }
  func.func @transform_7(%arg0: i32, %arg1: i32) -> (i32, i32, i32) {
    %c0_i32 = arith.constant 0 : i32
    %c0_i32_0 = arith.constant 0 : i32
    return %arg0, %c0_i32, %arg1 : i32, i32, i32
  }
  func.func @transform_8(%arg0: i32, %arg1: i32) -> (i32, i32, i32) {
    %c0_i32 = arith.constant 0 : i32
    %c0_i32_0 = arith.constant 0 : i32
    return %arg0, %c0_i32, %arg1 : i32, i32, i32
  }
}

module attributes {stable_mosaic.version = 11 : i64} {
  func.func @_bn_residual_kernel(%arg0: i32, %arg1: i32, %arg2: memref<1x16x64xbf16, #tpu.memory_space<vmem>>, %arg3: memref<1x16x64xf32, #tpu.memory_space<vmem>>, %arg4: memref<1x16x1xf32, #tpu.memory_space<vmem>>, %arg5: memref<1x16x1xf32, #tpu.memory_space<vmem>>, %arg6: memref<1x16x64xf32, #tpu.memory_space<vmem>>) attributes {dimension_semantics = [#tpu.dimension_semantics<parallel>, #tpu.dimension_semantics<parallel>], iteration_bounds = array<i64: 2, 1>, scalar_prefetch = 0 : i64, scratch_operands = 0 : i64, tpu.core_type = #tpu.core_type<tc>, window_params = [{transform_indices = @transform_0, window_bounds = array<i64: 1, 16, 64>}, {transform_indices = @transform_1, window_bounds = array<i64: 1, 16, 64>}, {pipeline_mode = #tpu.pipeline_mode<synchronous>, transform_indices = @transform_2, window_bounds = array<i64: 1, 16, 1>}, {pipeline_mode = #tpu.pipeline_mode<synchronous>, transform_indices = @transform_3, window_bounds = array<i64: 1, 16, 1>}, {transform_indices = @transform_4, window_bounds = array<i64: 1, 16, 64>}]} {
    %c0 = arith.constant 0 : index
    %c0_0 = arith.constant 0 : index
    %c0_1 = arith.constant 0 : index
    %0 = vector.load %arg2[%c0, %c0_0, %c0_1] : memref<1x16x64xbf16, #tpu.memory_space<vmem>>, vector<1x16x64xbf16>
    %1 = arith.extf %0 : vector<1x16x64xbf16> to vector<1x16x64xf32>
    %c0_2 = arith.constant 0 : index
    %c0_3 = arith.constant 0 : index
    %c0_4 = arith.constant 0 : index
    %2 = vector.load %arg4[%c0_2, %c0_3, %c0_4] : memref<1x16x1xf32, #tpu.memory_space<vmem>>, vector<1x16x1xf32>
    %3 = vector.broadcast %2 : vector<1x16x1xf32> to vector<1x16x64xf32>
    %4 = arith.mulf %1, %3 : vector<1x16x64xf32>
    %c0_5 = arith.constant 0 : index
    %c0_6 = arith.constant 0 : index
    %c0_7 = arith.constant 0 : index
    %5 = vector.load %arg5[%c0_5, %c0_6, %c0_7] : memref<1x16x1xf32, #tpu.memory_space<vmem>>, vector<1x16x1xf32>
    %6 = vector.broadcast %5 : vector<1x16x1xf32> to vector<1x16x64xf32>
    %7 = arith.addf %4, %6 : vector<1x16x64xf32>
    %c0_8 = arith.constant 0 : index
    %c0_9 = arith.constant 0 : index
    %c0_10 = arith.constant 0 : index
    %8 = vector.load %arg3[%c0_8, %c0_9, %c0_10] : memref<1x16x64xf32, #tpu.memory_space<vmem>>, vector<1x16x64xf32>
    %9 = arith.addf %7, %8 : vector<1x16x64xf32>
    %c0_11 = arith.constant 0 : index
    %c0_12 = arith.constant 0 : index
    %c0_13 = arith.constant 0 : index
    %10 = vector.load %arg6[%c0_11, %c0_12, %c0_13] : memref<1x16x64xf32, #tpu.memory_space<vmem>>, vector<1x16x64xf32>
    tpu.vector_store %arg6[%c0_11, %c0_12, %c0_13], %9 {strides = array<i32>} : memref<1x16x64xf32, #tpu.memory_space<vmem>>, vector<1x16x64xf32>,
    return
  }
  func.func @transform_0(%arg0: i32, %arg1: i32) -> (i32, i32, i32) {
    %c0_i32 = arith.constant 0 : i32
    %c0_i32_0 = arith.constant 0 : i32
    return %arg0, %c0_i32, %arg1 : i32, i32, i32
  }
  func.func @transform_1(%arg0: i32, %arg1: i32) -> (i32, i32, i32) {
    %c0_i32 = arith.constant 0 : i32
    %c0_i32_0 = arith.constant 0 : i32
    return %arg0, %c0_i32, %arg1 : i32, i32, i32
  }
  func.func @transform_2(%arg0: i32, %arg1: i32) -> (i32, i32, i32) {
    %c0_i32 = arith.constant 0 : i32
    %c0_i32_0 = arith.constant 0 : i32
    %c0_i32_1 = arith.constant 0 : i32
    %c0_i32_2 = arith.constant 0 : i32
    return %c0_i32, %c0_i32_0, %c0_i32_1 : i32, i32, i32
  }
  func.func @transform_3(%arg0: i32, %arg1: i32) -> (i32, i32, i32) {
    %c0_i32 = arith.constant 0 : i32
    %c0_i32_0 = arith.constant 0 : i32
    %c0_i32_1 = arith.constant 0 : i32
    %c0_i32_2 = arith.constant 0 : i32
    return %c0_i32, %c0_i32_0, %c0_i32_1 : i32, i32, i32
  }
  func.func @transform_4(%arg0: i32, %arg1: i32) -> (i32, i32, i32) {
    %c0_i32 = arith.constant 0 : i32
    %c0_i32_0 = arith.constant 0 : i32
    return %arg0, %c0_i32, %arg1 : i32, i32, i32
  }
}

</mosaic_0001>

<bundles_post_ra>
// kernel: self_attn_forward.5
= control target key start
LH: loop header
LB: loop body
LE: loop exit
PB: predicated region body
PF: predicated region fallthrough
CT: control target
= control target key end

     0   :  { %s497_s15 = smov 0   ;;  %s499_s16 = smov 0   ;;  %s545_s0 = inlined_call_operand.vmem [shape: bf16[2,16,64], index: 0, kind: input, shape index: {}]   ;;  %s546_s1 = inlined_call_operand.vmem [shape: f32[2,16,64], index: 1, kind: input, shape index: {}]   ;;  %s547_s2 = inlined_call_operand.vmem [shape: f32[1,16,1], index: 2, kind: input, shape index: {}]   ;;  %s548_s3 = inlined_call_operand.vmem [shape: f32[1,16,1], index: 3, kind: input, shape index: {}]   ;;  %s549_s4 = inlined_call_operand.vmem [shape: f32[2,16,64], index: 4, kind: output, shape index: {}]  }
   0x1   :  { %s501_s17 = smov 0  }
   0x2 LB: > { %s26_s18 = sadd.s32 1, %s465_s16  ;;  %p404_p0 = scmp.ge.s32.totalorder %s469_s17, 1  ;;  %s469_s17 = sphi %s501_s17, %s14_s17   ;;  %s465_s16 = sphi %s499_s16, %s551_s16   ;;  %s461_s15 = sphi %s497_s15, %s550_s15  }
   0x3   : > { %p28_p1 = scmp.ge.s32.totalorder %s26_s18, 2  ;;  %p196_p2 = scmp.lt.s32.totalorder %s469_s17, 3 }
   0x5   : > { %s553_s18 = smov (%p28_p1, %s26_s18), 0  ;;  %p197_p3 = pnand %p404_p0, %p196_p2 }
   0x6   : > { %p236_p4 = scmp.lt.s32.totalorder (!%p197_p3), %s461_s15, 1 }
   0x7   : > { %200 = sbr.rel (%p197_p3) target bundleno = 144 (0x90), region = 36 }
   0xc   : > { %v278_v0 = vld [vmem:[%s548_s3] sm:$0xff]  ;;  %v471_v2 = vmov 0   ;;  %v279_v3 = vld [vmem:[%s548_s3 + $0x8] sm:$0xff]  ;;  %s555_s15 = smov (!%p236_p4, %s461_s15), 1  ;;  %vm296_vm0 = vcmask 523264  }
   0xd   : > { %v264_v1 = vld [vmem:[%s547_s2] sm:$0xff]  ;;  %446 = vset.pattern.permute.xlu1 %v471_v2  ;;  %445 = vset.pattern.permute.xlu0 %v471_v2  ;;  %v265_v4 = vld [vmem:[%s547_s2 + $0x8] sm:$0xff]  ;;  %s413_s27 = sshll.u32 %s555_s15, 3  ;;  %s414_s5 = sshll.u32 %s555_s15, 4 }
   0xe   : > { %282 = vperm.xlu1 %446, %v278_v0   ;;  %268 = vperm.xlu0 %445, %v264_v1   ;;  %s243_s30 = scalar_lea.vmem %s545_s0, %s413_s27  ;;  %s251_s8 = scalar_lea.vmem %s546_s1, %s414_s5 }
   0xf   : > { %v417_v5 = vld [vmem:[%s243_s30] sm:$0xff]   ;;  %s259_s11 = scalar_lea.vmem %s549_s4, %s414_s5  ;;  %v293_v17 = vld [vmem:[%s251_s8 + $0x8] sm:$0xff] }
  0x10   : > { %v418_v6 = vunpack.c.l.bf16 %v417_v5  ;;  %v292_v10 = vld [vmem:[%s251_s8] sm:$0xff]  ;;  %v419_v13 = vunpack.c.h.bf16 %v417_v5 }
  0x16   : > { %287 = vperm.xlu1 %446, %v279_v3   ;;  %273 = vperm.xlu0 %445, %v265_v4  }
  0x80   : > { %v283_v7 = vpop.permute.xlu1 %282  ;;  %v269_v8 = vpop.permute.xlu0 %268 }
  0x81   : > { %v276_v9 = vmul.f32 %v418_v6, %v269_v8 }
  0x83   : > { %v290_v11 = vadd.f32 %v283_v7, %v276_v9 }
  0x85   : > { %v294_v12 = vadd.f32 %v292_v10, %v290_v11 }
  0x87   : > { %297 = vst.msk [vmem:[%s259_s11] sm:$0xff] %vm296_vm0, %v294_v12 }
  0x88   : > { %v274_v14 = vpop.permute.xlu0 %273  ;;  %v288_v16 = vpop.permute.xlu1 %287 }
  0x89   : > { %v277_v15 = vmul.f32 %v419_v13, %v274_v14 }
  0x8b   : > { %v291_v18 = vadd.f32 %v288_v16, %v277_v15 }
  0x8d   : > { %v295_v19 = vadd.f32 %v293_v17, %v291_v18 }
  0x8f   : > { %298 = vst.msk [vmem:[%s259_s11 + $0x8] sm:$0xff] %vm296_vm0, %v295_v19 }
  0x90 PF: > { %s14_s17 = sadd.s32 1, %s469_s17   ;;  %s550_s15 = smov %s465_s16 }
  0x91   : > { %p11_p5 = scmp.ge.s32.totalorder %s14_s17, 4   ;;  %s551_s16 = smov %s553_s18 }
  0x93   :  { %13 = sbr.rel (!%p11_p5) target bundleno = 2 (0x2), region = 69 }

// kernel: self_attn_forward.3
= control target key start
LH: loop header
LB: loop body
LE: loop exit
PB: predicated region body
PF: predicated region fallthrough
CT: control target
= control target key end

     0   :  { %s848_s27 = smov 0   ;;  %s850_s28 = smov 0   ;;  %s920_s0 = inlined_call_operand.vmem [shape: f32[2,16,64], index: 0, kind: input, shape index: {}]   ;;  %s921_s1 = inlined_call_operand.vmem [shape: f32[16,2], index: 1, kind: input, shape index: {}]   ;;  %s922_s2 = inlined_call_operand.vmem [shape: f32[2,1], index: 2, kind: input, shape index: {}]   ;;  %s923_s3 = inlined_call_operand.vmem [shape: f32[16,2], index: 3, kind: input, shape index: {}]   ;;  %s924_s4 = inlined_call_operand.vmem [shape: f32[2,1], index: 4, kind: input, shape index: {}]   ;;  %s925_s5 = inlined_call_operand.vmem [shape: f32[16,16], index: 5, kind: input, shape index: {}]   ;;  %s926_s6 = inlined_call_operand.vmem [shape: bf16[2,2,64], index: 6, kind: output, shape index: {0}]   ;;  %s927_s7 = inlined_call_operand.vmem [shape: bf16[2,2,64], index: 7, kind: output, shape index: {1}]   ;;  %s928_s8 = inlined_call_operand.vmem [shape: bf16[2,17,64], index: 8, kind: output, shape index: {2}]  }
   0x1   :  { %s852_s29 = smov 0  }
   0x2 LB: > { %s31_s30 = sadd.s32 1, %s796_s28  ;;  %p736_p0 = scmp.ge.s32.totalorder %s800_s29, 1  ;;  %s800_s29 = sphi %s852_s29, %s19_s29   ;;  %s796_s28 = sphi %s850_s28, %s930_s28   ;;  %s792_s27 = sphi %s848_s27, %s929_s27  }
   0x3   : > { %p33_p1 = scmp.ge.s32.totalorder %s31_s30, 2  ;;  %p290_p2 = scmp.lt.s32.totalorder %s800_s29, 3 }
   0x5   : > { %s932_s30 = smov (%p33_p1, %s31_s30), 0  ;;  %p291_p3 = pnand %p736_p0, %p290_p2 }
   0x6   : > { %p342_p4 = scmp.lt.s32.totalorder (!%p291_p3), %s792_s27, 1 }
   0x7   : > { %294 = sbr.rel (%p291_p3) target bundleno = 321 (0x141), region = 44 }
   0xc   : > { %v499_v0 = vld [vmem:[%s925_s5] sm:$0xff]  ;;  %s934_s27 = smov (!%p342_p4, %s792_s27), 1  ;;  %v500_v3 = vld [vmem:[%s925_s5 + $0x8] sm:$0xff]  ;;  %v802_v10 = vmov 0   ;;  %vm412_vm0 = vcmask 130048   ;;  %vm563_vm1 = vcmask 516096  }
   0xd   : > { %v372_v1 = vld [vmem:[%s921_s1] sm:$0xff]  ;;  %501 = vxpose.xlu0.b32.start [1/2] (short) (narrow) %v499_v0, 16  ;;  %s746_s15 = sshll.u32 %s934_s27, 4  ;;  %v373_v4 = vld [vmem:[%s921_s1 + $0x8] sm:$0xff]  ;;  %s749_s11 = smul.u32 12, %s934_s27  ;;  %vm570_vm4 = vcmask 519168  }
   0xe   : > { %380 = vxpose.xlu1.b32.start [1/2] (short) (narrow) %v372_v1, 8  ;;  %v436_v2 = vld [vmem:[%s923_s3] sm:$0xff]  ;;  %s349_s18 = scalar_lea.vmem %s920_s0, %s746_s15  ;;  %v437_v6 = vld [vmem:[%s923_s3 + $0x8] sm:$0xff]  ;;  %vm574_vm2 = vsmask.f32 256  ;;  %s361_s17 = scalar_lea.vmem %s927_s7, %s934_s27 }
   0xf   : > { %444 = vxpose.xlu2.b32.start [1/2] (short) (narrow) %v436_v2, 8  ;;  %v371_v5 = vld [vmem:[%s349_s18 + $0x8] sm:$0xff]  ;;  %v370_v7 = vld [vmem:[%s349_s18] sm:$0xff]  ;;  %s369_s14 = scalar_lea.vmem %s928_s8, %s749_s11  ;;  %vm575_vm3 = vmand %vm563_vm1, %vm574_vm2  ;;  %s355_s20 = scalar_lea.vmem %s926_s6, %s934_s27 }
  0x10   : > { %553 = vmatpush.msra.mxu2 %v371_v5  ;;  %747 = vmatpush.msra.mxu3 %v371_v5  ;;  %v374_v8 = vld [vmem:[%s922_s2] sm:$0x3]  ;;  %v576_v15 = vld [vmem:[%s369_s14 + $0x8] sm:$0x1] }
  0x11   : > { %430 = vmatpush.msra.mxu0 %v371_v5  ;;  %493 = vmatpush.msra.mxu1 %v371_v5  ;;  %v438_v9 = vld [vmem:[%s924_s4] sm:$0x3]  ;;  %v577_v16 = vsel %vm575_vm3, 1.0|1.0, %v576_v15 }
  0x12   : > { %554 = vmatpush.msra.mxu2 %v370_v7  ;;  %748 = vmatpush.msra.mxu3 %v370_v7  ;;  %578 = vst [vmem:[%s369_s14 + $0x8] sm:$0x1] %v577_v16 }
  0x13   : > { %431 = vmatpush.msra.mxu0 %v370_v7  ;;  %494 = vmatpush.msra.mxu1 %v370_v7 }
  0x15   : > { %502 = vxpose.xlu0.b32.end [2/2] (short) (narrow) %v500_v3, 16 }
  0x16   : > { %381 = vxpose.xlu1.b32.end [2/2] (short) (narrow) %v373_v4, 8 }
  0x17   : > { %445 = vxpose.xlu2.b32.end [2/2] (short) (narrow) %v437_v6, 8 }
  0x69   : > { %777 = vset.pattern.permute.xlu1 %v802_v10 }
  0x70   : > { %441 = vperm.xlu1 %777, %v438_v9  }
  0x7c   : > { %776 = vset.pattern.permute.xlu0 %v802_v10 }
  0x83   : > { %377 = vperm.xlu0 %776, %v374_v8  }
  0xa8   : > { %v460_v11 = vpop.trf.xlu2 }
  0xa9   : > { %741 = vmatmul.msk.f32.vlgmr.msra.gmra.mxu1 %vm412_vm0, %v460_v11 }
  0xb1   : > { %v517_v12 = vpop.trf.xlu0 }
  0xb2   : > { %v396_v13 = vpop.trf.xlu1  ;;  %742 = vmatmul.msk.f32.vlgmr.msra.gmra.mxu2 %vm412_vm0, %v517_v12 }
  0xb3   : > { %740 = vmatmul.msk.f32.vlgmr.msra.gmra.mxu0 %vm412_vm0, %v396_v13 }
  0xb9   : > { %v518_v14 = vpop.trf.xlu0 }
  0xba   : > { %743 = vmatmul.msk.f32.vlgmr.msra.gmra.mxu3 %vm412_vm0, %v518_v14 }
  0xe2   : > { %v442_v17 = vpop.permute.xlu1 %441 }
  0xf5   : > { %v378_v21 = vpop.permute.xlu0 %377 }
 0x126   : > { %v496_v18 = vpop.f32.mrf.mxu1 }
 0x127   : > { %v497_v19 = vadd.f32 %v496_v18, %v442_v17 }
 0x129   : > { %v565_v20 = vpack.c.bf16 %v497_v19, %v497_v19 }
 0x12b   : > { %566 = vst.msk [vmem:[%s361_s17] sm:$0x1] %vm563_vm1, %v565_v20 }
 0x130   : > { %v433_v22 = vpop.f32.mrf.mxu0 }
 0x131   : > { %v434_v23 = vadd.f32 %v433_v22, %v378_v21 }
 0x133   : > { %v562_v24 = vpack.c.bf16 %v434_v23, %v434_v23 }
 0x135   : > { %564 = vst.msk [vmem:[%s355_s20] sm:$0x1] %vm563_vm1, %v562_v24  ;;  %v556_v25 = vpop.f32.mrf.mxu2 }
 0x136   : > { %v567_v26 = vpack.c.bf16 %v556_v25, %v556_v25 }
 0x138   : > { %571 = vst.msk [vmem:[%s369_s14] sm:$0xf] %vm570_vm4, %v567_v26 }
 0x13d   : > { %v559_v27 = vpop.f32.mrf.mxu3 }
 0x13e   : > { %v568_v28 = vpack.c.bf16 %v559_v27, %v559_v27 }
 0x140   : > { %572 = vst.msk [vmem:[%s369_s14 + $0x4] sm:$0xf] %vm570_vm4, %v568_v28 }
 0x141 PF: > { %s19_s29 = sadd.s32 1, %s800_s29   ;;  %s929_s27 = smov %s796_s28 }
 0x142   : > { %p16_p5 = scmp.ge.s32.totalorder %s19_s29, 4   ;;  %s930_s28 = smov %s932_s30 }
 0x144   :  { %18 = sbr.rel (!%p16_p5) target bundleno = 2 (0x2), region = 98 }

// kernel: self_attn_forward.4
= control target key start
LH: loop header
LB: loop body
LE: loop exit
PB: predicated region body
PF: predicated region fallthrough
CT: control target
= control target key end

     0   :  { %s869_s18 = smov 0   ;;  %s871_s19 = smov 0   ;;  %s969_s0 = inlined_call_operand.vmem [shape: bf16[2,2,64], index: 0, kind: input, shape index: {}]   ;;  %s970_s1 = inlined_call_operand.vmem [shape: bf16[2,2,64], index: 1, kind: input, shape index: {}]   ;;  %s971_s2 = inlined_call_operand.vmem [shape: bf16[2,17,64], index: 2, kind: input, shape index: {}]   ;;  %s972_s3 = inlined_call_operand.vmem [shape: f32[16,1], index: 3, kind: input, shape index: {}]   ;;  %s973_s4 = inlined_call_operand.vmem [shape: bf16[2,16,64], index: 4, kind: output, shape index: {0}]   ;;  %s974_s5 = inlined_call_operand.vmem [shape: f32[2,1,16,2], index: 5, kind: output, shape index: {1}]  }
   0x1   :  { %s873_s20 = smov 0  }
   0x2 LB: > { %s35_s21 = sadd.s32 1, %s830_s19  ;;  %p736_p0 = scmp.ge.s32.totalorder %s834_s20, 1  ;;  %s834_s20 = sphi %s873_s20, %s16_s20   ;;  %s830_s19 = sphi %s871_s19, %s976_s19   ;;  %s826_s18 = sphi %s869_s18, %s975_s18  }
   0x3   : > { %p37_p1 = scmp.ge.s32.totalorder %s35_s21, 2  ;;  %p244_p2 = scmp.lt.s32.totalorder %s834_s20, 3 }
   0x5   : > { %s978_s21 = smov (%p37_p1, %s35_s21), 0  ;;  %p245_p3 = pnand %p736_p0, %p244_p2 }
   0x6   : > { %p299_p4 = scmp.lt.s32.totalorder (!%p245_p3), %s826_s18, 1 }
   0x7   : > { %248 = sbr.rel (%p245_p3) target bundleno = 718 (0x2ce), region = 36 }
   0xc   : > { %s980_s18 = smov (!%p299_p4, %s826_s18), 1  ;;  %vm381_vm0 = vcmask 1040384   ;;  %vm368_vm1 = vcmask 15360   ;;  %vm341_vm2 = vcmask 516096   ;;  %v836_v7 = vmov -inf   ;;  %v532_v40 = vld [vmem:[%s972_s3 + $0x8] sm:$0xff] }
   0xd   : > { %s310_s24 = scalar_lea.vmem %s970_s1, %s980_s18  ;;  %s304_s27 = scalar_lea.vmem %s969_s0, %s980_s18  ;;  %342 = vst.msk [vmem:[#allocation2] sm:$0x1] %vm341_vm2, %v836_v7  ;;  %vm343_vm3 = vcmask 523264   ;;  %v837_v28 = vmov 0.0   ;;  %v531_v41 = vld [vmem:[%s972_s3] sm:$0xff]  ;;  %v838_v43 = vmov 0  }
   0xe   : > { %v348_v0 = vld [vmem:[%s310_s24] sm:$0x1]  ;;  %344 = vst.msk [vmem:[#allocation3] sm:$0xff] %vm343_vm3, %v837_v28  ;;  %791 = vset.pattern.permute.xlu1 %v838_v43  ;;  %s762_s7 = smul.u32 12, %s980_s18  ;;  %s754_s11 = sshll.u32 %s980_s18, 3  ;;  %vm566_vm4 = vcmask 519168  }
   0xf   : > { %v347_v1 = vld [vmem:[%s304_s27] sm:$0x1]  ;;  %352 = vxpose.xlu0.c.b16.start.end [1/1] (short) (narrow) %v348_v0, 64  ;;  %345 = vst.msk [vmem:[#allocation3 + $0x8] sm:$0xff] %vm343_vm3, %v837_v28  ;;  %540 = vperm.xlu1 %791, %v532_v40   ;;  %s326_s14 = scalar_lea.vmem %s973_s4, %s754_s11  ;;  %s755_s15 = sshll.u32 %s980_s18, 4  ;;  %vm559_vm5 = vcmask 7168  }
  0x10   : > { %v383_v2 = vsel %vm381_vm0, %v347_v1, 0  ;;  %346 = vst.msk [vmem:[#allocation3 + $0x10] sm:$0x1] %vm341_vm2, %v837_v28  ;;  %s318_s10 = scalar_lea.vmem %s971_s2, %s762_s7  ;;  %s335_s22 = scalar_lea.vmem %s974_s5, %s755_s15 }
  0x11   : > { %392 = vmatpush.bf16.msra.mxu0 %v383_v2  ;;  %757 = vmatpush.bf16.msra.mxu2 %v383_v2 }
  0x14   : > { %v919_v37 = vld [vmem:[#allocation2] sm:$0x1] }
  0x76   : > { %790 = vset.pattern.permute.xlu0 %v838_v43 }
  0xad   : > { %535 = vperm.xlu0 %790, %v531_v41  }
  0xbb   : > { %v360_v3 = vpop.trf.xlu0 }
  0xbc   : > { %742 = vmatmul.msk.bf16.vlgmr.msra.gmra.mxu0 %vm368_vm1, %v360_v3 }
  0xcb   : > { %v361_v4 = vpop.trf.xlu0 }
  0xcc   : > { %743 = vmatmul.msk.bf16.gmra.mxu0 %vm368_vm1, %v361_v4 }
  0xdb   : > { %v362_v5 = vpop.trf.xlu0 }
  0xdc   : > { %744 = vmatmul.msk.bf16.vlgmr.msra.gmra.mxu2 %vm368_vm1, %v362_v5  ;;  %v351_v5 = vld [vmem:[%s318_s10 + $0x8] sm:$0x1] }
  0xeb   : > { %v363_v6 = vpop.trf.xlu0 }
  0xec   : > { %745 = vmatmul.msk.bf16.gmra.mxu2 %vm368_vm1, %v363_v6 }
 0x139   : > { %v902_v8 = vpop.f32.mrf.mxu0 }
 0x13a   : > { %v416_v19 = vsel %vm343_vm3, %v902_v8, -inf }
 0x141   : > { %v904_v10 = vpop.f32.mrf.mxu0 }
 0x142   : > { %v417_v16 = vsel %vm343_vm3, %v904_v10, -inf }
 0x149   : > { %v399_v12 = vpop.f32.mrf.mxu0 }
 0x14a   : > { %v418_v22 = vsel %vm343_vm3, %v399_v12, -inf }
 0x151   : > { %v401_v15 = vpop.f32.mrf.mxu0 }
 0x152   : > { %v419_v23 = vsel %vm343_vm3, %v401_v15, -inf }
 0x15f   : > { %v404_v9 = vpop.f32.mrf.mxu2 }
 0x160   : > { %v420_v17 = vsel %vm343_vm3, %v404_v9, -inf }
 0x161   : > { %v421_v25 = vmax.f32 %v416_v19, %v420_v17 }
 0x167   : > { %v406_v11 = vpop.f32.mrf.mxu2 }
 0x168   : > { %v422_v14 = vsel %vm343_vm3, %v406_v11, -inf }
 0x169   : > { %v423_v20 = vmax.f32 %v417_v16, %v422_v14  ;;  %v472_v16 = vld [vmem:[#allocation3] sm:$0xff] }
 0x16b   : > { %v428_v29 = vmax.f32 %v421_v25, %v423_v20  ;;  %v474_v20 = vld [vmem:[#allocation3 + $0x10] sm:$0x1] }
 0x16f   : > { %v409_v13 = vpop.f32.mrf.mxu2 }
 0x170   : > { %v424_v18 = vsel %vm343_vm3, %v409_v13, -inf }
 0x171   : > { %v425_v26 = vmax.f32 %v418_v22, %v424_v18 }
 0x177   : > { %v411_v21 = vpop.f32.mrf.mxu2 }
 0x178   : > { %v426_v24 = vsel %vm343_vm3, %v411_v21, -inf }
 0x179   : > { %v427_v27 = vmax.f32 %v419_v23, %v426_v24 }
 0x17b   : > { %v429_v30 = vmax.f32 %v425_v26, %v427_v27 }
 0x17d   : > { %v430_v31 = vmax.f32 %v428_v29, %v429_v30 }
 0x17f   : > { %v431_v32 = vrot.slane %v430_v31, 4 }
 0x181   : > { %v432_v33 = vmax.f32 %v430_v31, %v431_v32  ;;  %v541_v32 = vpop.permute.xlu1 %540 }
 0x183   : > { %v433_v34 = vrot.slane %v432_v33, 2 }
 0x185   : > { %v434_v35 = vmax.f32 %v432_v33, %v433_v34  ;;  %v536_v34 = vpop.permute.xlu0 %535 }
 0x187   : > { %v435_v36 = vrot.slane %v434_v35, 1 }
 0x189   : > { %v436_v38 = vmax.f32 %v434_v35, %v435_v36 }
 0x18b   : > { %v922_v39 = vmax.f32 %v919_v37, %v436_v38 }
 0x18d   : > { %v442_v42 = vperm.slane %v922_v39, 0  ;;  %520 = vst.msk [vmem:[#allocation2] sm:$0x1] %vm341_vm2, %v922_v39  ;;  %v438_v44 = vsub.f32 %v919_v37, %v922_v39 }
 0x18f   : > { %v451_v45 = vsub.f32 %v411_v21, %v442_v42  ;;  %v450_v46 = vsub.f32 %v409_v13, %v442_v42  ;;  %v448_v47 = vsub.f32 %v404_v9, %v442_v42  ;;  %v449_v48 = vsub.f32 %v406_v11, %v442_v42  ;;  %v756_v11 = vld [vmem:[%s318_s10] sm:$0xff]  ;;  %v473_v21 = vld [vmem:[#allocation3 + $0x8] sm:$0xff] }
 0x190   : > { %v446_v52 = vsub.f32 %v399_v12, %v442_v42  ;;  %v447_v54 = vsub.f32 %v401_v15, %v442_v42  ;;  %v444_v56 = vsub.f32 %v902_v8, %v442_v42  ;;  %v445_v58 = vsub.f32 %v904_v10, %v442_v42 }
 0x191   : > { %v466_v49 = vmul.f32 1.442695, %v451_v45  ;;  %v464_v50 = vmul.f32 1.442695, %v450_v46  ;;  %v460_v51 = vmul.f32 1.442695, %v448_v47  ;;  %v486_v9 = vunpack.c.l.b16 %v351_v5 }
 0x192   : > { %v462_v53 = vmul.f32 1.442695, %v449_v48  ;;  %v456_v55 = vmul.f32 1.442695, %v446_v52  ;;  %v458_v57 = vmul.f32 1.442695, %v447_v54 }
 0x193   : > { %792 = vpow2.f32 %v466_v49  ;;  %v452_v60 = vmul.f32 1.442695, %v444_v56  ;;  %v454_v62 = vmul.f32 1.442695, %v445_v58  ;;  %v488_v12 = vpack.c.b16 %v486_v9, %v486_v9 }
 0x194   : > { %794 = vpow2.f32 %v464_v50  ;;  %v439_v13 = vmul.f32 1.442695, %v438_v44 }
 0x195   : > { %796 = vpow2.f32 %v460_v51 }
 0x196   : > { %798 = vpow2.f32 %v462_v53 }
 0x197   : > { %800 = vpow2.f32 %v456_v55 }
 0x198   : > { %802 = vpow2.f32 %v458_v57 }
 0x199   : > { %v793_v59 = vpop.eup %792  ;;  %804 = vpow2.f32 %v452_v60 }
 0x19a   : > { %v795_v61 = vpop.eup %794  ;;  %806 = vpow2.f32 %v454_v62 }
 0x19b   : > { %v797_v63 = vpop.eup %796  ;;  %v471_v0 = vpack.c.bf16 %v793_v59, %v795_v61  ;;  %808 = vpow2.f32 %v439_v13 }
 0x19c   : > { %v799_v1 = vpop.eup %798 }
 0x19d   : > { %499 = vmatpush.bf16.msra.mxu1 %v471_v0  ;;  %758 = vmatpush.bf16.msra.mxu3 %v471_v0  ;;  %v801_v2 = vpop.eup %800  ;;  %v470_v3 = vpack.c.bf16 %v799_v1, %v797_v63 }
 0x19e   : > { %v803_v4 = vpop.eup %802 }
 0x19f   : > { %v805_v6 = vpop.eup %804  ;;  %v469_v7 = vpack.c.bf16 %v803_v4, %v801_v2 }
 0x1a0   : > { %v807_v8 = vpop.eup %806 }
 0x1a1   : > { %500 = vmatpush.bf16.msra.mxu1 %v470_v3  ;;  %759 = vmatpush.bf16.msra.mxu3 %v470_v3  ;;  %v468_v10 = vpack.c.bf16 %v807_v8, %v805_v6  ;;  %v809_v14 = vpop.eup %808 }
 0x1a2   : > { %v476_v15 = vperm.slane %v809_v14, 0 }
 0x1a4   : > { %v478_v17 = vmul.f32 %v476_v15, %v472_v16  ;;  %v480_v22 = vmul.f32 %v476_v15, %v474_v20  ;;  %v479_v25 = vmul.f32 %v476_v15, %v473_v21 }
 0x1a5   : > { %501 = vmatpush.bf16.msra.mxu1 %v469_v7  ;;  %760 = vmatpush.bf16.msra.mxu3 %v469_v7 }
 0x1a9   : > { %502 = vmatpush.bf16.msra.mxu1 %v468_v10  ;;  %761 = vmatpush.bf16.msra.mxu3 %v468_v10 }
 0x1ac   : > { %750 = vmatmul.msk.bf16.vlgmr.msra.gmra.mxu1 %vm343_vm3, %v756_v11  ;;  %751 = vmatmul.msk.bf16.vlgmr.msra.gmra.mxu3 %vm343_vm3, %v488_v12 }
 0x229   : > { %v504_v18 = vpop.f32.mrf.mxu1 }
 0x22a   : > { %v513_v19 = vadd.f32 %v504_v18, %v478_v17 }
 0x22c   : > { %516 = vst.msk [vmem:[#allocation3] sm:$0xff] %vm343_vm3, %v513_v19 }
 0x22f   : > { %v509_v23 = vpop.f32.mrf.mxu3 }
 0x230   : > { %v515_v24 = vadd.f32 %v509_v23, %v480_v22 }
 0x231   : > { %v506_v26 = vpop.f32.mrf.mxu1 }
 0x232   : > { %519 = vst.msk [vmem:[#allocation3 + $0x10] sm:$0x1] %vm341_vm2, %v515_v24  ;;  %v514_v27 = vadd.f32 %v506_v26, %v479_v25 }
 0x233   : > { %v524_v35 = vld [vmem:[#allocation3] sm:$0xff] }
 0x234   : > { %517 = vst.msk [vmem:[#allocation3 + $0x8] sm:$0xff] %vm343_vm3, %v514_v27 }
 0x237   : > { %v511_v28 = vpop.f32.mrf.mxu3 }
 0x239   : > { %v526_v29 = vld [vmem:[#allocation3 + $0x10] sm:$0x1] }
 0x23a   : > { %810 = vrcp.f32 %v526_v29 }
 0x23b   : > { %v525_v33 = vld [vmem:[#allocation3 + $0x8] sm:$0xff] }
 0x240   : > { %v811_v30 = vpop.eup %810 }
 0x241   : > { %v528_v31 = vperm.slane %v811_v30, 0 }
 0x243   : > { %v530_v36 = vmul.f32 %v528_v31, %v525_v33  ;;  %v529_v37 = vmul.f32 %v528_v31, %v524_v35 }
 0x245   : > { %v544_v38 = vadd.f32 %v541_v32, %v530_v36  ;;  %v543_v39 = vadd.f32 %v536_v34, %v529_v37 }
 0x247   : > { %v565_v40 = vpack.c.bf16 %v544_v38, %v544_v38  ;;  %v564_v41 = vpack.c.bf16 %v543_v39, %v543_v39  ;;  %v548_v42 = vsel %vm343_vm3, %v544_v38, 0.0  ;;  %v545_v43 = vsel %vm343_vm3, %v543_v39, 0.0 }
 0x248   : > { %549 = vadd.xlane.f32.xlu2 %v548_v42  ;;  %546 = vadd.xlane.f32.xlu1 %v545_v43  ;;  %v551_v44 = vmul.f32 %v543_v39, %v543_v39  ;;  %v552_v46 = vmul.f32 %v544_v38, %v544_v38 }
 0x249   : > { %568 = vst.msk [vmem:[%s326_s14 + $0x4] sm:$0xf] %vm566_vm4, %v565_v40 }
 0x24a   : > { %567 = vst.msk [vmem:[%s326_s14] sm:$0xf] %vm566_vm4, %v564_v41  ;;  %v553_v45 = vsel %vm343_vm3, %v551_v44, 0.0  ;;  %v556_v47 = vsel %vm343_vm3, %v552_v46, 0.0 }
 0x250   : > { %554 = vadd.xlane.f32.xlu2 %v553_v45 }
 0x258   : > { %557 = vadd.xlane.f32.xlu2 %v556_v47 }
 0x2bb   : > { %v550_v48 = vpop.xlane.xlu2 %549  ;;  %v547_v49 = vpop.xlane.xlu1 %546 }
 0x2c3   : > { %v555_v50 = vpop.xlane.xlu2 %554 }
 0x2c4   : > { %v560_v51 = vsel %vm559_vm5, %v547_v49, %v555_v50 }
 0x2c5   : > { %562 = vst.msk [vmem:[%s335_s22] sm:$0xff] %vm368_vm1, %v560_v51 }
 0x2cb   : > { %v558_v52 = vpop.xlane.xlu2 %557 }
 0x2cc   : > { %v561_v53 = vsel %vm559_vm5, %v550_v48, %v558_v52 }
 0x2cd   : > { %563 = vst.msk [vmem:[%s335_s22 + $0x8] sm:$0xff] %vm368_vm1, %v561_v53 }
 0x2ce PF: > { %s16_s20 = sadd.s32 1, %s834_s20   ;;  %s975_s18 = smov %s830_s19 }
 0x2cf   : > { %p13_p5 = scmp.ge.s32.totalorder %s16_s20, 4   ;;  %s976_s19 = smov %s978_s21 }
 0x2d1   :  { %15 = sbr.rel (!%p13_p5) target bundleno = 2 (0x2), region = 92 }

</bundles_post_ra>
